<compile_context>
chip_gen: v6e
topology: v6e:2x2x1
jax: 0.10.0
libtpu: 0.0.40
codegen_flags: <defaults>
</compile_context>

<pallas_src>
import functools

import jax
import jax.numpy as jnp
from jax.experimental import pallas as pl
from jax.experimental.pallas import tpu as pltpu

_HID = 64      # hidden width of FeedForwardNN_64
_SUB = 8       # TPU sublane width
_WALIGN = 16   # sublane alignment covering both f32 (8,128) and bf16 (16,128) tiles


def _round_up(n, m):
    return (n + m - 1) // m * m


def mlp_kernel(x_ref, w12_ref, w3_ref, b1_ref, b2_ref, b3_ref, o_ref, *,
               in_dim, w2_off):
    """relu(relu(x@W1+b1)@W2+b2)@W3+b3 on one batch tile.

    x_ref  : (tb, in_dim)        streamed activation tile (true feature width)
    w12_ref: (w2_off + 64, 64)   resident [W1 (rows 0:in_dim) ; W2 (rows w2_off:...)]
    w3_ref : (64, out_dim)       resident
    b*_ref : (1, 64)/(1, 64)/(1, out_dim) f32 biases, resident
    o_ref  : (tb, out_dim)       f32 output tile
    """
    x = x_ref[...]
    w1 = w12_ref[0:in_dim, :]
    w2 = w12_ref[w2_off:w2_off + _HID, :]

    h1 = jnp.maximum(
        jnp.dot(x, w1, preferred_element_type=jnp.float32) + b1_ref[...], 0.0)
    h2 = jnp.maximum(
        jnp.dot(h1.astype(w2.dtype), w2, preferred_element_type=jnp.float32)
        + b2_ref[...], 0.0)
    out = jnp.dot(h2.astype(w3_ref.dtype), w3_ref[...],
                  preferred_element_type=jnp.float32) + b3_ref[...]
    o_ref[...] = out.astype(o_ref.dtype)


def _choose_tile(batch, block_batch):
    """Sublane-aligned batch tile; >=2 grid steps on moderate batches (v7x megacore)."""
    if batch > block_batch:
        tb = _round_up(block_batch, _SUB)
    elif batch > 2 * _SUB:
        tb = _round_up(pl.cdiv(batch, 2), _SUB)   # split so both v7x TCs get work
    else:
        tb = batch                                 # single block == full dim
    return tb if tb < batch else batch


def feedforward_nn_64(x, params, *, param_dtype=jnp.float32, block_batch=16384):
    """Forward pass of FeedForwardNN_64.

    x: (batch, in_dim) or (in_dim,) array-like. Streamed in its incoming float
       dtype (pass bf16 x to halve activation HBM traffic, e.g. on v5e).
    params: dict with w1 (in_dim,64), b1 (1,64), w2 (64,64), b2 (1,64),
            w3 (64,out_dim), b3 (1,out_dim).
    param_dtype: storage dtype for the weight matrices (f32 or bf16); biases are
                 always f32 and accumulation is always f32.
    block_batch: requested rows per grid step (capped by a per-generation-safe
                 VMEM budget).
    """
    # Mirror the module: non-tensor (non-float) inputs become f32, 1-D obs gets a
    # batch dim (obs.unsqueeze(0)).
    x = jnp.asarray(x)
    if not jnp.issubdtype(x.dtype, jnp.floating):
        x = x.astype(jnp.float32)
    if x.ndim == 1:
        x = x[None, :]

    batch, in_dim = x.shape
    out_dim = params["w3"].shape[1]
    pdt = jnp.dtype(param_dtype)

    # Resident weight slab [W1 ; W2] (W2 offset 16-sublane aligned) + W3.
    w2_off = _round_up(max(in_dim, 1), _WALIGN)
    w12 = jnp.zeros((w2_off + _HID, _HID), pdt)
    w12 = w12.at[:in_dim, :].set(params["w1"].astype(pdt))
    w12 = w12.at[w2_off:w2_off + _HID, :].set(params["w2"].astype(pdt))
    w3 = params["w3"].astype(pdt)
    # Biases stay f32 (tiny; avoids avoidable quantization in the bf16 path).
    b1 = params["b1"].astype(jnp.float32).reshape(1, _HID)
    b2 = params["b2"].astype(jnp.float32).reshape(1, _HID)
    b3 = params["b3"].astype(jnp.float32).reshape(1, out_dim)

    # VMEM budget per grid step: double-buffered x/out tiles + f32 h1/h2/out temps.
    # Kept well under the default scoped VMEM on all of v5e / v6e / v7x.
    per_row = (2 * in_dim * x.dtype.itemsize + 2 * out_dim * 4
               + (2 * _HID + out_dim) * 4)
    max_tb = max(_SUB, (24 * 1024 * 1024 // per_row) // _SUB * _SUB)
    tb = _choose_tile(batch, min(block_batch, max_tb))
    # Trailing partial block: OOB rows read garbage but each output row depends
    # only on its own input row and OOB writes are dropped -> exact result.
    grid = (pl.cdiv(batch, tb),)

    flops = 2 * batch * (in_dim * _HID + _HID * _HID + _HID * out_dim)
    bytes_accessed = (x.size * x.dtype.itemsize
                      + w12.size * w12.dtype.itemsize
                      + w3.size * w3.dtype.itemsize
                      + (2 * _HID + out_dim) * 4
                      + batch * out_dim * 4)

    kernel = functools.partial(mlp_kernel, in_dim=in_dim, w2_off=w2_off)

    return pl.pallas_call(
        kernel,
        out_shape=jax.ShapeDtypeStruct((batch, out_dim), jnp.float32),
        grid=grid,
        in_specs=[
            pl.BlockSpec((tb, in_dim), lambda i: (i, 0)),   # streamed x tiles
            pl.BlockSpec(w12.shape, lambda i: (0, 0)),      # resident weights
            pl.BlockSpec(w3.shape, lambda i: (0, 0)),
            pl.BlockSpec(b1.shape, lambda i: (0, 0)),
            pl.BlockSpec(b2.shape, lambda i: (0, 0)),
            pl.BlockSpec(b3.shape, lambda i: (0, 0)),
        ],
        out_specs=pl.BlockSpec((tb, out_dim), lambda i: (i, 0)),
        compiler_params=pltpu.CompilerParams(
            dimension_semantics=("parallel",),              # megacore on v7x
            vmem_limit_bytes=32 * 1024 * 1024,
        ),
        cost_estimate=pl.CostEstimate(
            flops=flops, transcendentals=0, bytes_accessed=bytes_accessed),
    )(x, w12, w3, b1, b2, b3)


def init_params(key, in_dim, out_dim, no_nodes=64):
    """Deterministic init mimicking nn.Linear's U(-1/sqrt(fan_in), 1/sqrt(fan_in))."""
    ks = jax.random.split(key, 6)

    def linear(kw, kb, fan_in, fan_out):
        bound = 1.0 / jnp.sqrt(fan_in)
        w = jax.random.uniform(kw, (fan_in, fan_out), jnp.float32, -bound, bound)
        b = jax.random.uniform(kb, (1, fan_out), jnp.float32, -bound, bound)
        return w, b

    w1, b1 = linear(ks[0], ks[1], in_dim, no_nodes)
    w2, b2 = linear(ks[2], ks[3], no_nodes, no_nodes)
    w3, b3 = linear(ks[4], ks[5], no_nodes, out_dim)
    return {"w1": w1, "b1": b1, "w2": w2, "b2": b2, "w3": w3, "b3": b3}


# TODO(synk): self.odometer forward-call counter is Python-side nn.Module state,
# not a tensor op; it has no kernel equivalent and is omitted.


if __name__ == "__main__":
    key = jax.random.PRNGKey(0)
    k_params, k_x1, k_x2 = jax.random.split(key, 3)

    in_dim, out_dim = 16, 4
    params = init_params(k_params, in_dim, out_dim)

    def ref_forward(xx):
        h1 = jnp.maximum(xx @ params["w1"] + params["b1"], 0.0)
        h2 = jnp.maximum(h1 @ params["w2"] + params["b2"], 0.0)
        return h2 @ params["w3"] + params["b3"]

    # Small batch: single grid step, exact vs. reference.
    x_small = jax.random.normal(k_x1, (8, in_dim), dtype=jnp.float32)
    out_small = jax.block_until_ready(feedforward_nn_64(x_small, params))
    assert out_small.shape == (8, out_dim)
    assert jnp.allclose(out_small, ref_forward(x_small), atol=1e-5, rtol=1e-5)

    # 1-D observation (mirrors obs.unsqueeze(0)).
    x_1d = x_small[0]
    out_1d = jax.block_until_ready(feedforward_nn_64(x_1d, params))
    assert out_1d.shape == (1, out_dim)
    assert jnp.allclose(out_1d, ref_forward(x_1d[None, :]), atol=1e-5, rtol=1e-5)

    # Larger batch with a small forced tile: multi-step grid + partial trailing block.
    x_big = jax.random.normal(k_x2, (200, in_dim), dtype=jnp.float32)
    out_big = jax.block_until_ready(
        feedforward_nn_64(x_big, params, block_batch=64))
    assert out_big.shape == (200, out_dim)
    assert jnp.allclose(out_big, ref_forward(x_big), atol=1e-5, rtol=1e-5)

    # Default tile selection path (>=2 grid steps so v7x megacore is exercised).
    out_def = jax.block_until_ready(feedforward_nn_64(x_big, params))
    assert jnp.allclose(out_def, ref_forward(x_big), atol=1e-5, rtol=1e-5)

    # bf16 weight storage / f32 accumulation path (HBM-traffic option; biases f32).
    out_bf16 = jax.block_until_ready(
        feedforward_nn_64(x_big, params, param_dtype=jnp.bfloat16, block_batch=64))
    assert out_bf16.shape == (200, out_dim)
    assert jnp.allclose(out_bf16, ref_forward(x_big), atol=5e-2, rtol=5e-2)

    print("KERNEL_OK")
</pallas_src>

<mosaic_0001>
module attributes {stable_mosaic.version = 11 : i64} {
  func.func @mlp_kernel(%arg0: i32, %arg1: memref<8x16xf32, #tpu.memory_space<vmem>>, %arg2: memref<80x64xf32, #tpu.memory_space<vmem>>, %arg3: memref<64x4xf32, #tpu.memory_space<vmem>>, %arg4: memref<1x64xf32, #tpu.memory_space<vmem>>, %arg5: memref<1x64xf32, #tpu.memory_space<vmem>>, %arg6: memref<1x4xf32, #tpu.memory_space<vmem>>, %arg7: memref<8x4xf32, #tpu.memory_space<vmem>>) attributes {dimension_semantics = [#tpu.dimension_semantics<parallel>], iteration_bounds = array<i64: 1>, scalar_prefetch = 0 : i64, scratch_operands = 0 : i64, tpu.core_type = #tpu.core_type<tc>, window_params = [{transform_indices = @transform_0, window_bounds = array<i64: 8, 16>}, {pipeline_mode = #tpu.pipeline_mode<synchronous>, transform_indices = @transform_1, window_bounds = array<i64: 80, 64>}, {pipeline_mode = #tpu.pipeline_mode<synchronous>, transform_indices = @transform_2, window_bounds = array<i64: 64, 4>}, {pipeline_mode = #tpu.pipeline_mode<synchronous>, transform_indices = @transform_3, window_bounds = array<i64: 1, 64>}, {pipeline_mode = #tpu.pipeline_mode<synchronous>, transform_indices = @transform_4, window_bounds = array<i64: 1, 64>}, {pipeline_mode = #tpu.pipeline_mode<synchronous>, transform_indices = @transform_5, window_bounds = array<i64: 1, 4>}, {transform_indices = @transform_6, window_bounds = array<i64: 8, 4>}]} {
    %c0 = arith.constant 0 : index
    %c0_0 = arith.constant 0 : index
    %0 = vector.load %arg1[%c0, %c0_0] : memref<8x16xf32, #tpu.memory_space<vmem>>, vector<8x16xf32>
    %c0_1 = arith.constant 0 : index
    %c0_2 = arith.constant 0 : index
    %1 = vector.load %arg2[%c0_1, %c0_2] : memref<80x64xf32, #tpu.memory_space<vmem>>, vector<16x64xf32>
    %c16 = arith.constant 16 : index
    %c0_3 = arith.constant 0 : index
    %2 = vector.load %arg2[%c16, %c0_3] : memref<80x64xf32, #tpu.memory_space<vmem>>, vector<64x64xf32>
    %cst = arith.constant dense<0.000000e+00> : vector<8x64xf32>
    %3 = tpu.matmul %0, %1, %cst {dimension_numbers = #tpu.dot_dimension_numbers<[1], [0], [0], [1], [0, 0, 1, 1], [], []>} : vector<8x16xf32>, vector<16x64xf32>, vector<8x64xf32> -> vector<8x64xf32>
    %c0_4 = arith.constant 0 : index
    %c0_5 = arith.constant 0 : index
    %4 = vector.load %arg4[%c0_4, %c0_5] : memref<1x64xf32, #tpu.memory_space<vmem>>, vector<1x64xf32>
    %5 = vector.broadcast %4 : vector<1x64xf32> to vector<8x64xf32>
    %6 = arith.addf %3, %5 : vector<8x64xf32>
    %cst_6 = arith.constant 0.000000e+00 : f32
    %7 = vector.broadcast %cst_6 : f32 to vector<8x64xf32>
    %8 = arith.maximumf %6, %7 : vector<8x64xf32>
    %cst_7 = arith.constant dense<0.000000e+00> : vector<8x64xf32>
    %9 = tpu.matmul %8, %2, %cst_7 {dimension_numbers = #tpu.dot_dimension_numbers<[1], [0], [0], [1], [0, 0, 1, 1], [], []>} : vector<8x64xf32>, vector<64x64xf32>, vector<8x64xf32> -> vector<8x64xf32>
    %c0_8 = arith.constant 0 : index
    %c0_9 = arith.constant 0 : index
    %10 = vector.load %arg5[%c0_8, %c0_9] : memref<1x64xf32, #tpu.memory_space<vmem>>, vector<1x64xf32>
    %11 = vector.broadcast %10 : vector<1x64xf32> to vector<8x64xf32>
    %12 = arith.addf %9, %11 : vector<8x64xf32>
    %cst_10 = arith.constant 0.000000e+00 : f32
    %13 = vector.broadcast %cst_10 : f32 to vector<8x64xf32>
    %14 = arith.maximumf %12, %13 : vector<8x64xf32>
    %c0_11 = arith.constant 0 : index
    %c0_12 = arith.constant 0 : index
    %15 = vector.load %arg3[%c0_11, %c0_12] : memref<64x4xf32, #tpu.memory_space<vmem>>, vector<64x4xf32>
    %cst_13 = arith.constant dense<0.000000e+00> : vector<8x4xf32>
    %16 = tpu.matmul %14, %15, %cst_13 {dimension_numbers = #tpu.dot_dimension_numbers<[1], [0], [0], [1], [0, 0, 1, 1], [], []>} : vector<8x64xf32>, vector<64x4xf32>, vector<8x4xf32> -> vector<8x4xf32>
    %c0_14 = arith.constant 0 : index
    %c0_15 = arith.constant 0 : index
    %17 = vector.load %arg6[%c0_14, %c0_15] : memref<1x4xf32, #tpu.memory_space<vmem>>, vector<1x4xf32>
    %18 = vector.broadcast %17 : vector<1x4xf32> to vector<8x4xf32>
    %19 = arith.addf %16, %18 : vector<8x4xf32>
    %c0_16 = arith.constant 0 : index
    %c0_17 = arith.constant 0 : index
    %20 = vector.load %arg7[%c0_16, %c0_17] : memref<8x4xf32, #tpu.memory_space<vmem>>, vector<8x4xf32>
    tpu.vector_store %arg7[%c0_16, %c0_17], %19 {strides = array<i32>} : memref<8x4xf32, #tpu.memory_space<vmem>>, vector<8x4xf32>,
    return
  }
  func.func @transform_0(%arg0: i32) -> (i32, i32) {
    %c0_i32 = arith.constant 0 : i32
    %c0_i32_0 = arith.constant 0 : i32
    return %arg0, %c0_i32 : i32, i32
  }
  func.func @transform_1(%arg0: i32) -> (i32, i32) {
    %c0_i32 = arith.constant 0 : i32
    %c0_i32_0 = arith.constant 0 : i32
    %c0_i32_1 = arith.constant 0 : i32
    return %c0_i32, %c0_i32_0 : i32, i32
  }
  func.func @transform_2(%arg0: i32) -> (i32, i32) {
    %c0_i32 = arith.constant 0 : i32
    %c0_i32_0 = arith.constant 0 : i32
    %c0_i32_1 = arith.constant 0 : i32
    return %c0_i32, %c0_i32_0 : i32, i32
  }
  func.func @transform_3(%arg0: i32) -> (i32, i32) {
    %c0_i32 = arith.constant 0 : i32
    %c0_i32_0 = arith.constant 0 : i32
    %c0_i32_1 = arith.constant 0 : i32
    return %c0_i32, %c0_i32_0 : i32, i32
  }
  func.func @transform_4(%arg0: i32) -> (i32, i32) {
    %c0_i32 = arith.constant 0 : i32
    %c0_i32_0 = arith.constant 0 : i32
    %c0_i32_1 = arith.constant 0 : i32
    return %c0_i32, %c0_i32_0 : i32, i32
  }
  func.func @transform_5(%arg0: i32) -> (i32, i32) {
    %c0_i32 = arith.constant 0 : i32
    %c0_i32_0 = arith.constant 0 : i32
    %c0_i32_1 = arith.constant 0 : i32
    return %c0_i32, %c0_i32_0 : i32, i32
  }
  func.func @transform_6(%arg0: i32) -> (i32, i32) {
    %c0_i32 = arith.constant 0 : i32
    %c0_i32_0 = arith.constant 0 : i32
    return %arg0, %c0_i32 : i32, i32
  }
}

</mosaic_0001>

<bundles_post_ra>
// kernel: tpu_custom_call.1
= control target key start
LH: loop header
LB: loop body
LE: loop exit
PB: predicated region body
PF: predicated region fallthrough
CT: control target
= control target key end

     0   :  { %v366_v0 = vmov 0.0   ;;  %vm367_vm0 = vmmov 0   ;;  %vm41_vm1 = vcmask 130048   ;;  %vm123_vm2 = vcmask 523264   ;;  %s498_s1 = inlined_call_operand.vmem [shape: f32[80,64], index: 1, kind: input, shape index: {}]   ;;  %s499_s0 = inlined_call_operand.vmem [shape: f32[8,16], index: 0, kind: input, shape index: {}]   ;;  %s500_s2 = inlined_call_operand.vmem [shape: f32[64,4], index: 2, kind: input, shape index: {}]   ;;  %s501_s3 = inlined_call_operand.vmem [shape: f32[1,64], index: 3, kind: input, shape index: {}]   ;;  %s502_s4 = inlined_call_operand.vmem [shape: f32[1,64], index: 4, kind: input, shape index: {}]   ;;  %s503_s5 = inlined_call_operand.vmem [shape: f32[1,4], index: 5, kind: input, shape index: {}]   ;;  %s504_s6 = inlined_call_operand.vmem [shape: f32[8,4], index: 6, kind: output, shape index: {}]  }
   0x1   :  { %319 = vmatprep.subr.mxu0 %v366_v0  ;;  %v25_v1 = vld [vmem:[%s498_s1 + $0x8] sm:$0xff]  ;;  %v24_v2 = vld [vmem:[%s498_s1] sm:$0xff]  ;;  %323 = vmatprep.mubr.msk.f32.mxu0 %vm367_vm0, %v366_v0  ;;  %v31_v6 = vld [vmem:[%s498_s1 + $0x38] sm:$0xff]  ;;  %vm286_vm3 = vcmask 31744  }
   0x2   :  { %320 = vmatpush3.msra.mxu0 %v25_v1  ;;  %v23_v3 = vld [vmem:[%s499_s0] sm:$0xff]  ;;  %326 = vmatprep.subr.mxu1 %v366_v0  ;;  %v33_v4 = vld [vmem:[%s498_s1 + $0x48] sm:$0xff]  ;;  %v30_v7 = vld [vmem:[%s498_s1 + $0x30] sm:$0xff] }
   0x3   :  { %v32_v5 = vld [vmem:[%s498_s1 + $0x40] sm:$0xff]  ;;  %321 = vmatprep.subr.mxu0 %v366_v0  ;;  %327 = vmatpush3.msra.mxu1 %v33_v4  ;;  %v29_v8 = vld [vmem:[%s498_s1 + $0x28] sm:$0xff]  ;;  %v27_v10 = vld [vmem:[%s498_s1 + $0x18] sm:$0xff] }
   0x4   :  { %322 = vmatpush3.msra.mxu0 %v24_v2  ;;  %328 = vmatprep.subr.mxu1 %v366_v0  ;;  %v28_v9 = vld [vmem:[%s498_s1 + $0x20] sm:$0xff]  ;;  %v26_v11 = vld [vmem:[%s498_s1 + $0x10] sm:$0xff]  ;;  %v205_v12 = vld [vmem:[%s500_s2 + $0x38] sm:$0xff] }
   0x5   :  { %324 = vmatmul.mubr.msk.f32.vlgmr.msra.gmra.mxu0 %vm41_vm1, %v23_v3  ;;  %329 = vmatpush3.msra.mxu1 %v32_v5  ;;  %v204_v13 = vld [vmem:[%s500_s2 + $0x30] sm:$0xff]  ;;  %v203_v14 = vld [vmem:[%s500_s2 + $0x28] sm:$0xff]  ;;  %v202_v15 = vld [vmem:[%s500_s2 + $0x20] sm:$0xff] }
   0x6   :  { %330 = vmatprep.subr.mxu1 %v366_v0  ;;  %342 = vmatprep.mubr.msk.f32.mxu1 %vm367_vm0, %v366_v0  ;;  %v201_v16 = vld [vmem:[%s500_s2 + $0x18] sm:$0xff]  ;;  %v292_v17 = vld [vmem:[%s501_s3] ss:$0 sm:$0xff]  ;;  %v200_v22 = vld [vmem:[%s500_s2 + $0x10] sm:$0xff] }
   0x7   :  { %331 = vmatpush3.msra.mxu1 %v31_v6  ;;  %345 = vmatprep.subr.mxu0 %v366_v0  ;;  %v199_v23 = vld [vmem:[%s500_s2 + $0x8] sm:$0xff]  ;;  %v198_v24 = vld [vmem:[%s500_s2] sm:$0xff] }
   0x8   :  { %332 = vmatprep.subr.mxu1 %v366_v0  ;;  %361 = vmatprep.mubr.msk.f32.mxu0 %vm367_vm0, %v366_v0  ;;  %v294_v25 = vld [vmem:[%s502_s4] ss:$0 sm:$0xff] }
   0x9   :  { %333 = vmatpush3.msra.mxu1 %v30_v7  ;;  %346 = vmatpush3.msra.mxu0 %v205_v12  ;;  %v296_v30 = vld [vmem:[%s503_s5] ss:$0 sm:$0xff] }
   0xa   :  { %334 = vmatprep.subr.mxu1 %v366_v0  ;;  %347 = vmatprep.subr.mxu0 %v366_v0 }
   0xb   :  { %335 = vmatpush3.msra.mxu1 %v29_v8  ;;  %348 = vmatpush3.msra.mxu0 %v204_v13 }
   0xc   :  { %336 = vmatprep.subr.mxu1 %v366_v0  ;;  %349 = vmatprep.subr.mxu0 %v366_v0 }
   0xd   :  { %337 = vmatpush3.msra.mxu1 %v28_v9  ;;  %350 = vmatpush3.msra.mxu0 %v203_v14 }
   0xe   :  { %338 = vmatprep.subr.mxu1 %v366_v0  ;;  %351 = vmatprep.subr.mxu0 %v366_v0 }
   0xf   :  { %339 = vmatpush3.msra.mxu1 %v27_v10  ;;  %352 = vmatpush3.msra.mxu0 %v202_v15 }
  0x10   :  { %340 = vmatprep.subr.mxu1 %v366_v0  ;;  %353 = vmatprep.subr.mxu0 %v366_v0 }
  0x11   :  { %341 = vmatpush3.msra.mxu1 %v26_v11  ;;  %354 = vmatpush3.msra.mxu0 %v201_v16 }
  0x12   :  { %355 = vmatprep.subr.mxu0 %v366_v0 }
  0x13   :  { %356 = vmatpush3.msra.mxu0 %v200_v22 }
  0x14   :  { %357 = vmatprep.subr.mxu0 %v366_v0 }
  0x15   :  { %358 = vmatpush3.msra.mxu0 %v199_v23 }
  0x16   :  { %359 = vmatprep.subr.mxu0 %v366_v0 }
  0x17   :  { %360 = vmatpush3.msra.mxu0 %v198_v24 }
  0xc5   :  { %v111_v18 = vpop.f32.mrf.mxu0 }
  0xc6   :  { %v112_v19 = vadd.f32 %v292_v17, %v111_v18 }
  0xc7   :  { %v325_v20 = vpop.f32.mrf.mxu0 }
  0xc8   :  { %v115_v21 = vmax.f32 %v112_v19, 0.0 }
  0xca   :  { %343 = vmatmul.mubr.msk.f32.vlgmr.msra.gmra.mxu1 %vm123_vm2, %v115_v21 }
 0x18a   :  { %v193_v26 = vpop.f32.mrf.mxu1 }
 0x18b   :  { %v194_v27 = vadd.f32 %v294_v25, %v193_v26 }
 0x18c   :  { %v344_v28 = vpop.f32.mrf.mxu1 }
 0x18d   :  { %v197_v29 = vmax.f32 %v194_v27, 0.0 }
 0x18f   :  { %362 = vmatmul.mubr.msk.f32.vlgmr.msra.gmra.mxu0 %vm123_vm2, %v197_v29 }
 0x24f   :  { %v282_v31 = vpop.f32.mrf.mxu0 }
 0x250   :  { %v283_v32 = vadd.f32 %v296_v30, %v282_v31 }
 0x251   :  { %v363_v33 = vpop.f32.mrf.mxu0 }
 0x252   :  { %287 = vst.msk [vmem:[%s504_s6] sm:$0xff] %vm286_vm3, %v283_v32 }

</bundles_post_ra>
